<compile_context>
chip_gen: v5e
topology: v5e:2x2
jax: 0.10.0
libtpu: 0.0.40
codegen_flags: <defaults>
</compile_context>

<pallas_src>
import jax
import jax.numpy as jnp
from jax import lax
from jax.experimental import pallas as pl
from jax.experimental.pallas import tpu as pltpu


def _pos_enc_kernel(params_ref, out_ref):
    # params_ref: (2, L) f32 in VMEM -- row 0 = per-lane angle scale,
    #                                   row 1 = per-lane angle offset (incl. pi/2 phase)
    # out_ref:    (tile_r, L) f32 VMEM tile of the (possibly lane-packed) table.
    tile_r, _ = out_ref.shape
    row0 = pl.program_id(0) * tile_r

    # (tile_r, 1) global row index as f32; broadcasts against the (1, L) params.
    r = (lax.broadcasted_iota(jnp.int32, (tile_r, 1), 0) + row0).astype(jnp.float32)

    scale = params_ref[0:1, :]   # (1, L)
    offset = params_ref[1:2, :]  # (1, L)

    # angle = pos * inv_freq + phase ; cos handled via sin(x + pi/2).
    out_ref[...] = jnp.sin(r * scale + offset)


def positional_encoding(x: jax.Array, d_model: int) -> jax.Array:
    """Forward pass: returns the PE table of shape (seq_len, d_model), f32.

    x: [batch, seq_len] -- only the shape is used (matches the PyTorch module).
    """
    _, seq_len = x.shape

    # ---- column-only constants, computed once outside the kernel ----
    j = jnp.arange(d_model, dtype=jnp.float32)
    two_i = j - jnp.mod(j, 2.0)                          # exponent 2i = j - (j % 2)
    inv_freq = 1.0 / (10000.0 ** (two_i / d_model))      # (d_model,) f32
    phase = jnp.mod(jnp.arange(d_model), 2).astype(jnp.float32) * (jnp.pi / 2.0)

    # ---- lane-dense packing for small d_model: k logical rows per 128-lane row ----
    packed = (d_model < 128) and (128 % d_model == 0)
    if packed:
        k = 128 // d_model
        lane = 128
        n_rows = pl.cdiv(seq_len, k)                                    # pad ragged tail
        inv_l = jnp.tile(inv_freq, k)                                   # (128,)
        ph_l = jnp.tile(phase, k)                                       # (128,)
        colb = jnp.repeat(jnp.arange(k, dtype=jnp.float32), d_model)    # (128,)
        # pos = g*k + colb  ->  angle = g*(k*inv_freq) + (colb*inv_freq + phase)
        scale = jnp.float32(k) * inv_l
        offset = colb * inv_l + ph_l
    else:
        lane = d_model
        n_rows = seq_len
        scale = inv_freq
        offset = phase

    params = jnp.stack([scale, offset], axis=0)          # (2, lane) f32

    # ---- tile sizing: large tiles to amortize per-step overhead, capped so the
    # double-buffered output stays well inside v7x's smaller (64 MiB) VMEM ----
    bytes_per_row = lane * 4
    vmem_budget = 4 * 1024 * 1024                        # per output buffer (x2 buffered)
    max_rows = max(8, (vmem_budget // bytes_per_row) // 8 * 8)
    tile_r = min(n_rows, 512, max_rows)
    if tile_r < n_rows:
        tile_r = max(8, (tile_r // 8) * 8)               # keep (8, 128) tiling constraint
    elif n_rows >= 16:
        # keep >= 2 grid steps so the "parallel" axis can shard across 2 TCs
        half = (n_rows + 1) // 2
        tile_r = ((half + 7) // 8) * 8
    grid = (pl.cdiv(n_rows, tile_r),)                    # ragged tail handled by Pallas

    table = pl.pallas_call(
        _pos_enc_kernel,
        out_shape=jax.ShapeDtypeStruct((n_rows, lane), jnp.float32),
        grid_spec=pltpu.PrefetchScalarGridSpec(
            num_scalar_prefetch=0,
            grid=grid,
            in_specs=[pl.BlockSpec((2, lane), lambda i: (0, 0))],
            out_specs=pl.BlockSpec((tile_r, lane), lambda i: (i, 0)),
        ),
        compiler_params=pltpu.CompilerParams(
            dimension_semantics=("parallel",),
        ),
        cost_estimate=pl.CostEstimate(
            flops=2 * n_rows * lane,
            transcendentals=n_rows * lane,
            bytes_accessed=n_rows * lane * 4 + 2 * lane * 4,
        ),
    )(params)

    if packed:
        # Row-major bytes are identical; reshape + leading-dim slice is layout plumbing.
        table = table.reshape(n_rows * k, d_model)[:seq_len, :]
    return table


def _reference(seq_len: int, d_model: int) -> jnp.ndarray:
    # Pure-JAX reference mirroring the PyTorch __init__ construction.
    pos = jnp.arange(seq_len, dtype=jnp.float32)[:, None]
    _2i = jnp.arange(0, d_model, 2, dtype=jnp.float32)
    enc = jnp.zeros((seq_len, d_model), dtype=jnp.float32)
    enc = enc.at[:, 0::2].set(jnp.sin(pos / 10000 ** (_2i / d_model)))
    enc = enc.at[:, 1::2].set(jnp.cos(pos / 10000 ** (_2i / d_model)))
    return enc


if __name__ == "__main__":
    # Global-setting stand-ins (the PyTorch module pulls these from a config):
    d_model = 32
    batch, seq_len = 2, 8

    key = jax.random.PRNGKey(0)
    # x values are irrelevant to the forward pass; only the shape matters.
    x = jax.random.normal(key, (batch, seq_len), dtype=jnp.float32)

    out = positional_encoding(x, d_model)
    out = jax.block_until_ready(out)

    ref = _reference(seq_len, d_model)
    assert out.shape == (seq_len, d_model)
    assert out.dtype == jnp.float32
    assert jnp.allclose(out, ref, atol=1e-5, rtol=1e-5)

    # Plain (unpacked) path with a multi-step grid.
    d_model2, seq_len2 = 128, 16
    x2 = jax.random.normal(key, (batch, seq_len2), dtype=jnp.float32)
    out2 = jax.block_until_ready(positional_encoding(x2, d_model2))
    assert jnp.allclose(out2, _reference(seq_len2, d_model2), atol=1e-5, rtol=1e-5)

    # Packed path with a ragged (non-divisible) sequence length.
    d_model3, seq_len3 = 64, 9
    x3 = jax.random.normal(key, (batch, seq_len3), dtype=jnp.float32)
    out3 = jax.block_until_ready(positional_encoding(x3, d_model3))
    assert out3.shape == (seq_len3, d_model3)
    assert jnp.allclose(out3, _reference(seq_len3, d_model3), atol=1e-5, rtol=1e-5)

    print("KERNEL_OK")
</pallas_src>

<mosaic_0001>
module attributes {stable_mosaic.version = 11 : i64} {
  func.func @_pos_enc_kernel(%arg0: i32, %arg1: memref<2x128xf32, #tpu.memory_space<vmem>>, %arg2: memref<2x128xf32, #tpu.memory_space<vmem>>) attributes {dimension_semantics = [#tpu.dimension_semantics<parallel>], iteration_bounds = array<i64: 1>, scalar_prefetch = 0 : i64, scratch_operands = 0 : i64, tpu.core_type = #tpu.core_type<tc>, window_params = [{pipeline_mode = #tpu.pipeline_mode<synchronous>, transform_indices = @transform_0, window_bounds = array<i64: 2, 128>}, {transform_indices = @transform_1, window_bounds = array<i64: 2, 128>}]} {
    %c2_i32 = arith.constant 2 : i32
    %0 = arith.muli %arg0, %c2_i32 : i32
    %1 = tpu.iota {dimensions = array<i32: 0>} : vector<2x1xi32>
    %2 = vector.broadcast %0 : i32 to vector<2x1xi32>
    %3 = arith.addi %1, %2 : vector<2x1xi32>
    %4 = arith.sitofp %3 : vector<2x1xi32> to vector<2x1xf32>
    %c0 = arith.constant 0 : index
    %c0_0 = arith.constant 0 : index
    %5 = vector.load %arg1[%c0, %c0_0] : memref<2x128xf32, #tpu.memory_space<vmem>>, vector<1x128xf32>
    %c1 = arith.constant 1 : index
    %c0_1 = arith.constant 0 : index
    %6 = vector.load %arg1[%c1, %c0_1] : memref<2x128xf32, #tpu.memory_space<vmem>>, vector<1x128xf32>
    %7 = vector.broadcast %4 : vector<2x1xf32> to vector<2x128xf32>
    %8 = vector.broadcast %5 : vector<1x128xf32> to vector<2x128xf32>
    %9 = arith.mulf %7, %8 : vector<2x128xf32>
    %10 = vector.broadcast %6 : vector<1x128xf32> to vector<2x128xf32>
    %11 = arith.addf %9, %10 : vector<2x128xf32>
    %12 = math.sin %11 : vector<2x128xf32>
    %c0_2 = arith.constant 0 : index
    %c0_3 = arith.constant 0 : index
    %13 = vector.load %arg2[%c0_2, %c0_3] : memref<2x128xf32, #tpu.memory_space<vmem>>, vector<2x128xf32>
    tpu.vector_store %arg2[%c0_2, %c0_3], %12 {strides = array<i32>} : memref<2x128xf32, #tpu.memory_space<vmem>>, vector<2x128xf32>,
    return
  }
  func.func @transform_0(%arg0: i32) -> (i32, i32) {
    %c0_i32 = arith.constant 0 : i32
    %c0_i32_0 = arith.constant 0 : i32
    %c0_i32_1 = arith.constant 0 : i32
    return %c0_i32, %c0_i32_0 : i32, i32
  }
  func.func @transform_1(%arg0: i32) -> (i32, i32) {
    %c0_i32 = arith.constant 0 : i32
    %c0_i32_0 = arith.constant 0 : i32
    return %arg0, %c0_i32 : i32, i32
  }
}

</mosaic_0001>

<bundles_post_ra>
// kernel: tpu_custom_call.1
= control target key start
LH: loop header
LB: loop body
LE: loop exit
PB: predicated region body
PF: predicated region fallthrough
CT: control target
= control target key end

     0   :  { %6 = vsyncpa [#allocation3], 0  ;;  %s345_s0 = inlined_call_operand.hbm [shape: f32[2,128], index: 0, kind: input, shape index: {}]   ;;  %s346_s1 = inlined_call_operand.hbm [shape: f32[2,128], index: 1, kind: output, shape index: {}]  }
   0x1   :  { %7 = vsyncpa [#allocation4], 0  ;;  %s13_s8 = sshll.u32 %s345_s0, 4  ;;  %s274_s9 = smov [#allocation2]   ;;  %s14_s8 = int_to_ptr.hbm [resolvable:$true] %s13_s8 }
   0x2   :  { %s15_s10 = sshll.u32 %s274_s9, 4  ;;  %s16_s10 = int_to_ptr.vmem [resolvable:$true] %s15_s10 }
   0x3   :  { %18 = dma.hbm_to_vmem [thread:$0]  %s14_s8, 32, %s16_s10, [#allocation3]  }
   0x4   :  { %270 = dma.done.wait [#allocation3], 32  }
   0x5   :  { %271 = vsyncadd [#allocation3], 4294967264  ;;  %v24_v0 = vlaneseq  ;;  %v220_v3 = vld [vmem:[#allocation2] ss:$0 sm:$0xff]  ;;  %v221_v4 = vld [vmem:[#allocation2 + $0x1] ss:$0 sm:$0xff] }
   0x6   :  { %v275_v18 = vmov 683565275   ;;  %v276_v20 = vmov 2475754826   ;;  %v277_v22 = vmov 2131351028  }
   0x7   :  { %v25_v1 = vshrl.u32 %v24_v0, 7  ;;  %v278_v24 = vmov 2102212464   ;;  %v279_v26 = vmov 920167782   ;;  %s282_s0 = smov [#allocation5]  }
   0x8   :  { %v280_v32 = vmov 1326507024   ;;  %s196_s11 = sshll.u32 %s282_s0, 4  ;;  %s198_s14 = sshll.u32 %s346_s1, 4  ;;  %s197_s11 = int_to_ptr.vmem [resolvable:$true] %s196_s11  ;;  %s199_s14 = int_to_ptr.hbm [resolvable:$true] %s198_s14 }
   0x9   :  { %v28_v2 = vcvt.s32.f32 %v25_v1 }
   0xb   :  { %v32_v5 = vmul.f32 %v220_v3, %v28_v2 }
   0xd   :  { %v296_v6 = vadd.f32 %v221_v4, %v32_v5 }
   0xf   :  { %v38_v7 = vand.u32 2139095040, %v296_v6  ;;  %v35_v9 = vand.u32 2147483647, %v296_v6  ;;  %vm37_vm12 = vcmp.lt.s32.totalorder %v296_v6, 0 }
  0x11   :  { %v39_v8 = vshrl.u32 %v38_v7, 23  ;;  %v42_v12 = vand.u32 8388607, %v35_v9  ;;  %v281_v7 = vmov 0   ;;  %vm36_vm13 = vcmp.le.f32.partialorder %v35_v9, 0.7853982 }
  0x13   :  { %v208_v10 = vadd.s32 4294967169, %v39_v8  ;;  %v43_v15 = vor.u32 8388608, %v42_v12 }
  0x15   :  { %v45_v11 = vadd.s32 1, %v208_v10  ;;  %v305_v34 = vshll.u32 %v43_v15, 8 }
  0x17   :  { %vm46_vm0 = vcmp.gt.s32.totalorder %v45_v11, 0  ;;  %v84_v46 = vand.u32 65535, %v305_v34  ;;  %v85_v47 = vshrl.u32 %v305_v34, 16 }
  0x18   :  { %v47_v13 = vsel %vm46_vm0, %v45_v11, 0 }
  0x19   :  { %v49_v14 = vand.u32 31, %v47_v13  ;;  %v302_v16 = vshrl.u32 %v47_v13, 5 }
  0x1b   :  { %v50_v17 = vsub.s32 32, %v49_v14  ;;  %v52_v19 = vshll.u32 %v275_v18, %v49_v14  ;;  %v55_v21 = vshll.u32 %v276_v20, %v49_v14  ;;  %v58_v23 = vshll.u32 %v277_v22, %v49_v14 }
  0x1c   :  { %v61_v25 = vshll.u32 %v278_v24, %v49_v14  ;;  %v64_v27 = vshll.u32 %v279_v26, %v49_v14  ;;  %vm67_vm1 = vcmp.lt.s32.totalorder %v302_v16, 1  ;;  %vm70_vm2 = vcmp.lt.s32.totalorder %v302_v16, 4 }
  0x1d   :  { %v53_v28 = vshrl.u32 %v276_v20, %v50_v17  ;;  %v56_v29 = vshrl.u32 %v277_v22, %v50_v17  ;;  %v59_v30 = vshrl.u32 %v278_v24, %v50_v17  ;;  %v62_v31 = vshrl.u32 %v279_v26, %v50_v17 }
  0x1e   :  { %v65_v33 = vshrl.u32 %v280_v32, %v50_v17  ;;  %vm69_vm3 = vcmp.lt.s32.totalorder %v302_v16, 3  ;;  %vm68_vm4 = vcmp.lt.s32.totalorder %v302_v16, 2  ;;  %v51_v54 = vshrl.u32 %v275_v18, %v50_v17 }
  0x1f   :  { %v54_v35 = vor.u32 %v53_v28, %v52_v19  ;;  %v57_v36 = vor.u32 %v56_v29, %v55_v21  ;;  %v60_v37 = vor.u32 %v59_v30, %v58_v23  ;;  %v63_v38 = vor.u32 %v62_v31, %v61_v25 }
  0x20   :  { %v66_v39 = vor.u32 %v65_v33, %v64_v27 }
  0x21   :  { %v75_v40 = vsel %vm67_vm1, %v54_v35, %v57_v36  ;;  %v79_v41 = vsel %vm67_vm1, %v57_v36, %v60_v37  ;;  %v76_v42 = vsel %vm70_vm2, %v63_v38, 920167782  ;;  %v71_v3 = vsel %vm67_vm1, %v51_v54, %v54_v35 }
  0x22   :  { %v80_v43 = vsel %vm70_vm2, %v66_v39, 1326507024  ;;  %v77_v44 = vsel %vm69_vm3, %v60_v37, %v76_v42  ;;  %v72_v5 = vsel %vm70_vm2, %v60_v37, 2102212464  ;;  %vm178_vm1 = vweird.f32 %v296_v6 }
  0x23   :  { %v81_v45 = vsel %vm69_vm3, %v63_v38, %v80_v43  ;;  %v78_v48 = vsel %vm68_vm4, %v75_v40, %v77_v44  ;;  %v73_v18 = vsel %vm69_vm3, %v57_v36, %v72_v5 }
  0x24   :  { %v82_v49 = vsel %vm68_vm4, %v79_v41, %v81_v45  ;;  %v108_v52 = vand.u32 65535, %v78_v48  ;;  %v109_v53 = vshrl.u32 %v78_v48, 16  ;;  %v74_v26 = vsel %vm68_vm4, %v71_v3, %v73_v18 }
  0x25   :  { %v86_v50 = vand.u32 65535, %v82_v49  ;;  %v87_v51 = vshrl.u32 %v82_v49, 16  ;;  %v128_v30 = vmul.u32 %v305_v34, %v74_v26 }
  0x26   :  { %v110_v58 = vmul.u32 %v108_v52, %v84_v46  ;;  %v111_v59 = vmul.u32 %v109_v53, %v84_v46  ;;  %v112_v60 = vmul.u32 %v108_v52, %v85_v47  ;;  %v113_v0 = vmul.u32 %v109_v53, %v85_v47 }
  0x27   :  { %v88_v55 = vmul.u32 %v86_v50, %v84_v46  ;;  %v89_v56 = vmul.u32 %v87_v51, %v84_v46  ;;  %v90_v57 = vmul.u32 %v86_v50, %v85_v47  ;;  %v91_v61 = vmul.u32 %v87_v51, %v85_v47 }
  0x28   :  { %v114_v1 = vshll.u32 %v111_v59, 16  ;;  %v116_v2 = vshll.u32 %v112_v60, 16  ;;  %v115_v15 = vshrl.u32 %v111_v59, 16  ;;  %v117_v22 = vshrl.u32 %v112_v60, 16 }
  0x29   :  { %v92_v62 = vshll.u32 %v89_v56, 16  ;;  %v94_v63 = vshll.u32 %v90_v57, 16  ;;  %v93_v11 = vshrl.u32 %v89_v56, 16  ;;  %v95_v19 = vshrl.u32 %v90_v57, 16 }
  0x2a   :  { %vm118_vm6 = vc.u32 %v110_v58, %v114_v1  ;;  %v120_v10 = vadd.s32 %v114_v1, %v110_v58 }
  0x2b   :  { %vm96_vm5 = vc.u32 %v88_v55, %v92_v62  ;;  %v98_v4 = vadd.s32 %v92_v62, %v88_v55  ;;  %v119_v13 = vsel %vm118_vm6, 1, %v281_v7 }
  0x2c   :  { %v97_v8 = vsel %vm96_vm5, 1, %v281_v7  ;;  %v121_v17 = vadd.s32 %v119_v13, %v113_v0  ;;  %vm122_vm8 = vc.u32 %v120_v10, %v116_v2  ;;  %v124_v25 = vadd.s32 %v120_v10, %v116_v2 }
  0x2d   :  { %v99_v12 = vadd.s32 %v97_v8, %v91_v61  ;;  %vm100_vm7 = vc.u32 %v98_v4, %v94_v63  ;;  %v123_v21 = vsel %vm122_vm8, 1, %v281_v7 }
  0x2e   :  { %v101_v14 = vsel %vm100_vm7, 1, %v281_v7  ;;  %v125_v23 = vadd.s32 %v123_v21, %v121_v17 }
  0x2f   :  { %v103_v20 = vadd.s32 %v101_v14, %v99_v12 }
  0x30   :  { %v126_v27 = vadd.s32 %v125_v23, %v115_v15 }
  0x31   :  { %v104_v24 = vadd.s32 %v103_v20, %v93_v11 }
  0x32   :  { %v127_v29 = vadd.s32 %v126_v27, %v117_v22 }
  0x33   :  { %v105_v28 = vadd.s32 %v104_v24, %v95_v19 }
  0x34   :  { %v131_v31 = vadd.s32 1, %v127_v29 }
  0x35   :  { %vm130_vm9 = vc.u32 %v105_v28, %v124_v25  ;;  %v129_v16 = vadd.s32 %v124_v25, %v105_v28 }
  0x36   :  { %v132_v32 = vsel %vm130_vm9, %v131_v31, %v127_v29 }
  0x37   :  { %v133_v33 = vadd.s32 %v132_v32, %v128_v30 }
  0x39   :  { %v134_v35 = vadd.s32 536870912, %v133_v33 }
  0x3b   :  { %v135_v36 = vshrl.u32 %v134_v35, 30 }
  0x3d   :  { %v136_v37 = vshll.u32 %v135_v36, 30  ;;  %v159_v54 = vsub.s32 4, %v135_v36 }
  0x3f   :  { %v137_v38 = vsub.s32 %v133_v33, %v136_v37  ;;  %v160_v57 = vsel %vm37_vm12, %v159_v54, %v135_v36 }
  0x40   :  { %v162_v60 = vsel %vm36_vm13, 0, %v160_v57 }
  0x41   :  { %vm138_vm10 = vcmp.lt.s32.totalorder %v137_v38, 0  ;;  %v139_v39 = vsub.s32 0, %v137_v38  ;;  %v179_v1 = vadd.s32 3, %v162_v60 }
  0x43   :  { %v140_v40 = vsel %vm138_vm10, %v139_v39, %v137_v38  ;;  %v180_v7 = vand.u32 3, %v179_v1 }
  0x44   :  { %v141_v41 = vclz %v140_v40 }
  0x45   :  { %vm185_vm14 = vcmp.eq.s32.totalorder %v180_v7, 2  ;;  %vm182_vm15 = vcmp.eq.s32.totalorder %v180_v7, 0  ;;  %vm181_vm0 = vcmp.lt.s32.totalorder %v180_v7, 2 }
  0x46   :  { %v209_v42 = vadd.s32 4294967294, %v141_v41 }
  0x48   :  { %vm210_vm11 = vcmp.lt.s32.totalorder %v209_v42, 0 }
  0x49   :  { %v144_v43 = vsel %vm210_vm11, 0, %v209_v42 }
  0x4a   :  { %v145_v44 = vsub.s32 32, %v144_v43  ;;  %v146_v45 = vshll.u32 %v137_v38, %v144_v43  ;;  %v149_v46 = vsub.s32 4294967266, %v144_v43 }
  0x4c   :  { %v147_v34 = vshrl.u32 %v129_v16, %v145_v44  ;;  %v150_v47 = vadd.s32 127, %v149_v46 }
  0x4e   :  { %v148_v48 = vor.u32 %v147_v34, %v146_v45  ;;  %v151_v49 = vshll.u32 %v150_v47, 23 }
  0x50   :  { %v152_v50 = vor.u32 4788187, %v151_v49  ;;  %v155_v51 = vcvt.s32.f32 %v148_v48 }
  0x52   :  { %v153_v52 = vand.u32 2147483647, %v152_v50 }
  0x54   :  { %v156_v53 = vmul.f32 %v155_v51, %v153_v52 }
  0x56   :  { %v157_v55 = vxor.u32 2147483648, %v156_v53 }
  0x58   :  { %v158_v56 = vsel %vm37_vm12, %v157_v55, %v156_v53 }
  0x59   :  { %v161_v58 = vsel %vm36_vm13, %v296_v6, %v158_v56 }
  0x5a   :  { %v163_v59 = vmul.f32 %v161_v58, %v161_v58 }
  0x5c   :  { %v164_v61 = vmul.f32 -0.001358992, %v163_v59  ;;  %v171_v62 = vmul.f32 -0.00019511016, %v163_v59 }
  0x5e   :  { %v165_v63 = vadd.f32 0.041655596, %v164_v61  ;;  %v172_v0 = vadd.f32 0.008332121, %v171_v62 }
  0x60   :  { %v166_v2 = vmul.f32 %v165_v63, %v163_v59  ;;  %v173_v3 = vmul.f32 %v172_v0, %v163_v59 }
  0x62   :  { %v167_v4 = vadd.f32 -0.4999988, %v166_v2  ;;  %v174_v5 = vadd.f32 -0.16666654, %v173_v3 }
  0x64   :  { %v168_v8 = vmul.f32 %v167_v4, %v163_v59  ;;  %v175_v10 = vmul.f32 %v174_v5, %v163_v59 }
  0x66   :  { %v169_v9 = vadd.f32 1.0, %v168_v8  ;;  %v176_v11 = vadd.f32 1.0, %v175_v10 }
  0x68   :  { %v177_v12 = vmul.f32 %v176_v11, %v161_v58  ;;  %v186_v13 = vxor.u32 2147483648, %v169_v9 }
  0x6a   :  { %v183_v14 = vxor.u32 2147483648, %v177_v12  ;;  %v187_v15 = vsel %vm185_vm14, %v186_v13, %v177_v12 }
  0x6c   :  { %v184_v17 = vsel %vm182_vm15, %v169_v9, %v183_v14 }
  0x6d   :  { %v188_v18 = vsel %vm181_vm0, %v184_v17, %v187_v15 }
  0x6e   :  { %v189_v19 = vsel %vm178_vm1, nan, %v188_v18 }
  0x6f   :  { %190 = vst [vmem:[#allocation5] sm:$0x3] %v189_v19 }
  0x70   :  { %201 = dma.vmem_to_hbm [thread:$0]  %s197_s11, 32, %s199_s14, [#allocation4]  }
  0x71   :  { %272 = dma.done.wait [#allocation4], 32  }
  0x72   :  { %273 = vsyncadd [#allocation4], 4294967264 }
  0x73   :  { %206 = vsyncpa [#allocation3], 1 }
  0x74   :  { %207 = vsyncpa [#allocation4], 1 }

</bundles_post_ra>
